<compile_context>
chip_gen: v7x
topology: tpu7x:2x2x1
jax: 0.10.0
libtpu: 0.0.40
codegen_flags: <defaults>
</compile_context>

<pallas_src>
import functools

import jax
import jax.numpy as jnp
import numpy as np
from jax.experimental import pallas as pl
from jax.experimental.pallas import tpu as pltpu

_VMEM_BUDGET_BYTES = 40 * 1024 * 1024   # target working set (fits v7x's 64 MiB VMEM)
_VMEM_LIMIT_BYTES = 48 * 1024 * 1024    # explicit scoped-VMEM request


def _maxpool3_w(v):
    """Window-3 / stride-1 max along axis 1 (the W / sublane axis) of (R, W, C).

    Implicit -inf padding at the W borders (MaxPool2d semantics).
    """
    # TODO(synk): once pltpu.roll's rotate direction is pinned on the target
    # toolchain, move these shifts to the XLU (roll + iota mask) to free the
    # load/store slots; the concat form is the known-correct fallback.
    neg = jnp.full((v.shape[0], 1, v.shape[2]), float('-inf'), dtype=v.dtype)
    left = jnp.concatenate([neg, v[:, :-1, :]], axis=1)    # left[:, w]  = v[:, w-1]
    right = jnp.concatenate([v[:, 1:, :], neg], axis=1)    # right[:, w] = v[:, w+1]
    return jnp.maximum(jnp.maximum(left, v), right)


def _spp_kernel(w_ref, b_ref, x_ref, top_ref, bot_ref, o_ref, *, tile_h, W, C, n_h):
    """One (batch, H-tile) step of SPP.

    Blocks: w_ref (3, C, C) bf16 folded weights; b_ref (1, C) f32 folded bias;
    x_ref (1, tile_h, W, C) tile; top_ref/bot_ref (1, 2, W, C) halos;
    o_ref (1, tile_h, W, C).
    """
    ih = pl.program_id(1)
    rows = tile_h * W

    def branch_dot(v, group):
        # bf16 MXU operands, f32 accumulation.
        # TODO(synk): for FPN levels with W % 8 != 0 pad W in the wrapper so this
        # (tile_h, W, C) -> (tile_h*W, C) flatten stays layout-free.
        return jnp.dot(v.reshape(rows, C).astype(jnp.bfloat16), w_ref[group],
                       preferred_element_type=jnp.float32)

    xc = x_ref[0]                                     # (tile_h, W, C), input dtype
    # Identity branch first: the MXU starts while the VPU does the pooling below.
    y = branch_dot(xc, 0)

    # 2-row halos above/below the tile; halo rows outside the image act as -inf.
    neg = float('-inf')
    top = jnp.where(jnp.broadcast_to(ih == 0, top_ref[0].shape), neg, top_ref[0])
    bot = jnp.where(jnp.broadcast_to(ih == n_h - 1, bot_ref[0].shape), neg, bot_ref[0])
    xh = jnp.concatenate([top, xc, bot], axis=0)      # (tile_h + 4, W, C)

    # Separable 3x3 max pool; the H direction is static slices of the halo'd tile.
    r3 = jnp.maximum(jnp.maximum(xh[:-2], xh[1:-1]), xh[2:])     # (tile_h + 2, W, C)
    p3 = _maxpool3_w(r3)                  # 3x3 pool at tile rows -1 .. tile_h
    y = y + branch_dot(p3[1:-1], 1)

    # 5x5 pool == 3x3 applied twice (exact for stride-1 / implicit -inf padding).
    r5 = jnp.maximum(jnp.maximum(p3[:-2], p3[1:-1]), p3[2:])     # (tile_h, W, C)
    p5 = _maxpool3_w(r5)
    y = y + branch_dot(p5, 2)

    y = jnp.maximum(y + b_ref[...], 0.0)              # folded BN bias + ReLU
    # Single lane-dense store of the whole tile (C_out on the lane axis).
    o_ref[0] = y.reshape(tile_h, W, C).astype(o_ref.dtype)


def _fold_bn_into_conv(conv_w, bn_gamma, bn_beta, bn_mean, bn_var, eps):
    """Fold eval-mode BatchNorm into the 1x1 conv.  Returns (w2d, bias)."""
    scale = bn_gamma / jnp.sqrt(bn_var + eps)                 # (C_out,)
    w2d = conv_w[:, :, 0, 0] * scale[:, None]                 # (C_out, 3*C_in)
    bias = bn_beta - bn_mean * scale                          # (C_out,)
    return w2d, bias


def _pick_tile_h(H, W, C, dtype):
    """Largest even divisor of H whose working set fits the VMEM budget."""
    itemsize = np.dtype(dtype).itemsize
    # 2x double-buffered in + out tiles plus ~7 f32-row intermediates per tile row.
    per_row = 4 * W * C * itemsize + 7 * W * C * 4
    max_rows = int(_VMEM_BUDGET_BYTES // max(per_row, 1))
    if H <= max_rows:
        return H
    best = 0
    t = 2
    while t <= max_rows:
        if H % t == 0:
            best = t
        t += 2
    if best == 0:
        # TODO(synk): pad H so an even tile divides it; fall back to whole image.
        return H
    return best


def spp_forward_nhwc(x, conv_w, bn_gamma, bn_beta, bn_mean, bn_var, eps=1e-5,
                     tile_h=None):
    """SPP forward on an NHWC activation; returns NHWC (transpose-free, preferred)."""
    N, H, W, C = x.shape
    assert conv_w.shape == (C, 3 * C, 1, 1), conv_w.shape

    w2d, bias = _fold_bn_into_conv(conv_w, bn_gamma, bn_beta, bn_mean, bn_var, eps)
    # (C_out, 3*C_in) -> (group, C_in, C_out); groups = [identity, pool3, pool5].
    w_eff = jnp.transpose(w2d.reshape(C, 3, C), (1, 2, 0)).astype(jnp.bfloat16)
    b_eff = bias.reshape(1, C).astype(jnp.float32)

    if tile_h is None:
        tile_h = _pick_tile_h(H, W, C, x.dtype)
    tile_h = min(int(tile_h), H)
    if H % tile_h != 0 or (tile_h < H and (tile_h % 2 != 0 or H % 2 != 0)):
        tile_h = H                         # fall back to whole-image tiles
    n_h = H // tile_h
    half = tile_h // 2

    if n_h > 1:
        # Halo index maps in units of 2-row blocks; clamps keep indices in range
        # (rows outside the image are masked to -inf inside the kernel).
        top_map = lambda n, i: (n, jnp.maximum(i * half - 1, 0), 0, 0)
        bot_map = lambda n, i: (n, jnp.minimum((i + 1) * half, H // 2 - 1), 0, 0)
    else:
        top_map = lambda n, i: (n, 0, 0, 0)
        bot_map = lambda n, i: (n, 0, 0, 0)

    kernel = functools.partial(_spp_kernel, tile_h=tile_h, W=W, C=C, n_h=n_h)
    return pl.pallas_call(
        kernel,
        out_shape=jax.ShapeDtypeStruct((N, H, W, C), x.dtype),
        grid=(N, n_h),
        in_specs=[
            pl.BlockSpec((3, C, C), lambda n, i: (0, 0, 0)),            # bf16 weights
            pl.BlockSpec((1, C), lambda n, i: (0, 0)),                  # f32 bias
            pl.BlockSpec((1, tile_h, W, C), lambda n, i: (n, i, 0, 0)),  # tile
            pl.BlockSpec((1, 2, W, C), top_map),                        # halo above
            pl.BlockSpec((1, 2, W, C), bot_map),                        # halo below
        ],
        out_specs=pl.BlockSpec((1, tile_h, W, C), lambda n, i: (n, i, 0, 0)),
        compiler_params=pltpu.CompilerParams(
            dimension_semantics=("parallel", "parallel"),
            vmem_limit_bytes=_VMEM_LIMIT_BYTES,
        ),
        # NOTE: default double-buffering; sweep pl.Buffered(3) on the tile spec if
        # DMA latency shows up exposed on v6e/v7x.
    )(w_eff, b_eff, x, x, x)


def spp_forward(x, conv_w, bn_gamma, bn_beta, bn_mean, bn_var, eps=1e-5, tile_h=None):
    """Drop-in NCHW equivalent of the PyTorch module.

    Production callers should use spp_forward_nhwc and keep activations NHWC
    end-to-end: these two transposes are pure layout plumbing and roughly triple
    HBM traffic for this bandwidth-bound op.
    """
    x_nhwc = jnp.transpose(x, (0, 2, 3, 1))
    y = spp_forward_nhwc(x_nhwc, conv_w, bn_gamma, bn_beta, bn_mean, bn_var,
                         eps=eps, tile_h=tile_h)
    return jnp.transpose(y, (0, 3, 1, 2))


# ----------------------------- references (validation) -----------------------------

def _maxpool_nchw(v, k):
    p = k // 2
    return jax.lax.reduce_window(
        v, -jnp.inf, jax.lax.max,
        window_dimensions=(1, 1, k, k),
        window_strides=(1, 1, 1, 1),
        padding=((0, 0), (0, 0), (p, p), (p, p)))


def spp_reference(x, conv_w, bn_gamma, bn_beta, bn_mean, bn_var, eps=1e-5):
    """Full-precision NCHW reference matching the PyTorch module."""
    feat = jnp.concatenate([x, _maxpool_nchw(x, 3), _maxpool_nchw(x, 5)], axis=1)
    y = jnp.einsum('oi,nihw->nohw', conv_w[:, :, 0, 0], feat,
                   precision=jax.lax.Precision.HIGHEST)
    scale = bn_gamma / jnp.sqrt(bn_var + eps)
    y = y * scale[None, :, None, None] + (bn_beta - bn_mean * scale)[None, :, None, None]
    return jnp.maximum(y, 0.0)


def spp_reference_bf16_mxu(x, conv_w, bn_gamma, bn_beta, bn_mean, bn_var, eps=1e-5):
    """Reference modelling the kernel's only intentional precision loss: the folded
    conv runs on bf16-rounded operands with f32 accumulation (the MXU)."""
    w2d, bias = _fold_bn_into_conv(conv_w, bn_gamma, bn_beta, bn_mean, bn_var, eps)
    feat = jnp.concatenate([x, _maxpool_nchw(x, 3), _maxpool_nchw(x, 5)], axis=1)
    feat_q = feat.astype(jnp.bfloat16).astype(jnp.float32)
    w_q = w2d.astype(jnp.bfloat16).astype(jnp.float32)
    y = jnp.einsum('oi,nihw->nohw', w_q, feat_q,
                   precision=jax.lax.Precision.HIGHEST)
    return jnp.maximum(y + bias[None, :, None, None], 0.0)


if __name__ == "__main__":
    N, C, H, W = 2, 4, 16, 16
    key = jax.random.PRNGKey(0)
    k1, k2, k3, k4, k5, k6 = jax.random.split(key, 6)

    x = jax.random.normal(k1, (N, C, H, W), dtype=jnp.float32)
    conv_w = jax.random.normal(k2, (C, 3 * C, 1, 1), dtype=jnp.float32) * 0.1
    bn_gamma = jax.random.uniform(k3, (C,), jnp.float32, minval=0.5, maxval=1.5)
    bn_beta = jax.random.normal(k4, (C,), dtype=jnp.float32) * 0.1
    bn_mean = jax.random.normal(k5, (C,), dtype=jnp.float32) * 0.1
    bn_var = jax.random.uniform(k6, (C,), jnp.float32, minval=0.5, maxval=1.5)

    args = (x, conv_w, bn_gamma, bn_beta, bn_mean, bn_var)
    ref = jax.block_until_ready(spp_reference(*args))
    ref_q = jax.block_until_ready(spp_reference_bf16_mxu(*args))

    # Tiled path: 2 H-tiles with 2-row halos (exercises interior + both image borders).
    out_tiled = jax.block_until_ready(spp_forward(*args, tile_h=8))
    # Auto path: whole-image tile (exercises the n_h == 1 halo masking).
    out_auto = jax.block_until_ready(spp_forward(*args))

    assert out_tiled.shape == (N, C, H, W)
    assert out_auto.shape == (N, C, H, W)
    for out in (out_tiled, out_auto):
        # Tight structural check: matches a reference that models the bf16-input
        # MXU exactly; anything wrong in pooling / halos / weight layout / BN fold
        # would be orders of magnitude larger.
        np.testing.assert_allclose(np.asarray(out), np.asarray(ref_q),
                                   rtol=1e-3, atol=1e-3)
        # Loose semantic check vs the full-precision PyTorch module (tolerance
        # accommodates bf16 rounding of the MXU operands).
        np.testing.assert_allclose(np.asarray(out), np.asarray(ref),
                                   rtol=1e-1, atol=1e-1)
    print("KERNEL_OK")
</pallas_src>

<mosaic_0001>
module attributes {stable_mosaic.version = 11 : i64} {
  func.func @_spp_kernel(%arg0: i32, %arg1: i32, %arg2: memref<3x4x4xbf16, #tpu.memory_space<vmem>>, %arg3: memref<1x4xf32, #tpu.memory_space<vmem>>, %arg4: memref<1x8x16x4xf32, #tpu.memory_space<vmem>>, %arg5: memref<1x2x16x4xf32, #tpu.memory_space<vmem>>, %arg6: memref<1x2x16x4xf32, #tpu.memory_space<vmem>>, %arg7: memref<1x8x16x4xf32, #tpu.memory_space<vmem>>) attributes {dimension_semantics = [#tpu.dimension_semantics<parallel>, #tpu.dimension_semantics<parallel>], iteration_bounds = array<i64: 2, 2>, scalar_prefetch = 0 : i64, scratch_operands = 0 : i64, tpu.core_type = #tpu.core_type<tc>, window_params = [{pipeline_mode = #tpu.pipeline_mode<synchronous>, transform_indices = @transform_0, window_bounds = array<i64: 3, 4, 4>}, {pipeline_mode = #tpu.pipeline_mode<synchronous>, transform_indices = @transform_1, window_bounds = array<i64: 1, 4>}, {transform_indices = @transform_2, window_bounds = array<i64: 1, 8, 16, 4>}, {transform_indices = @transform_3, window_bounds = array<i64: 1, 2, 16, 4>}, {transform_indices = @transform_4, window_bounds = array<i64: 1, 2, 16, 4>}, {transform_indices = @transform_5, window_bounds = array<i64: 1, 8, 16, 4>}]} {
    %c0 = arith.constant 0 : index
    %c0_0 = arith.constant 0 : index
    %c0_1 = arith.constant 0 : index
    %c0_2 = arith.constant 0 : index
    %0 = vector.load %arg4[%c0, %c0_0, %c0_1, %c0_2] : memref<1x8x16x4xf32, #tpu.memory_space<vmem>>, vector<1x8x16x4xf32>
    %1 = vector.shape_cast %0 : vector<1x8x16x4xf32> to vector<8x16x4xf32>
    %2 = vector.shape_cast %1 : vector<8x16x4xf32> to vector<128x4xf32>
    %3 = arith.truncf %2 : vector<128x4xf32> to vector<128x4xbf16>
    %c0_3 = arith.constant 0 : index
    %c0_4 = arith.constant 0 : index
    %c0_5 = arith.constant 0 : index
    %4 = vector.load %arg2[%c0_3, %c0_4, %c0_5] : memref<3x4x4xbf16, #tpu.memory_space<vmem>>, vector<1x4x4xbf16>
    %5 = vector.shape_cast %4 : vector<1x4x4xbf16> to vector<4x4xbf16>
    %cst = arith.constant dense<0.000000e+00> : vector<128x4xf32>
    %6 = tpu.matmul %3, %5, %cst {dimension_numbers = #tpu.dot_dimension_numbers<[1], [0], [0], [1], [0, 0, 1, 1], [], []>} : vector<128x4xbf16>, vector<4x4xbf16>, vector<128x4xf32> -> vector<128x4xf32>
    %c0_i32 = arith.constant 0 : i32
    %7 = arith.cmpi eq, %arg1, %c0_i32 : i32
    %8 = vector.broadcast %7 : i1 to vector<2x16x4xi1>
    %c0_6 = arith.constant 0 : index
    %c0_7 = arith.constant 0 : index
    %c0_8 = arith.constant 0 : index
    %c0_9 = arith.constant 0 : index
    %9 = vector.load %arg5[%c0_6, %c0_7, %c0_8, %c0_9] : memref<1x2x16x4xf32, #tpu.memory_space<vmem>>, vector<1x2x16x4xf32>
    %10 = vector.shape_cast %9 : vector<1x2x16x4xf32> to vector<2x16x4xf32>
    %cst_10 = arith.constant 0xFF800000 : f32
    %11 = vector.broadcast %cst_10 : f32 to vector<2x16x4xf32>
    %12 = arith.select %8, %11, %10 : vector<2x16x4xi1>, vector<2x16x4xf32>
    %c1_i32 = arith.constant 1 : i32
    %13 = arith.cmpi eq, %arg1, %c1_i32 : i32
    %14 = vector.broadcast %13 : i1 to vector<2x16x4xi1>
    %c0_11 = arith.constant 0 : index
    %c0_12 = arith.constant 0 : index
    %c0_13 = arith.constant 0 : index
    %c0_14 = arith.constant 0 : index
    %15 = vector.load %arg6[%c0_11, %c0_12, %c0_13, %c0_14] : memref<1x2x16x4xf32, #tpu.memory_space<vmem>>, vector<1x2x16x4xf32>
    %16 = vector.shape_cast %15 : vector<1x2x16x4xf32> to vector<2x16x4xf32>
    %cst_15 = arith.constant 0xFF800000 : f32
    %17 = vector.broadcast %cst_15 : f32 to vector<2x16x4xf32>
    %18 = arith.select %14, %17, %16 : vector<2x16x4xi1>, vector<2x16x4xf32>
    %19 = tpu.concatenate %12, %1, %18 in 0 : vector<2x16x4xf32>, vector<8x16x4xf32>, vector<2x16x4xf32> -> vector<12x16x4xf32>
    %20 = vector.extract_strided_slice %19 {offsets = [0, 0, 0], sizes = [10, 16, 4], strides = [1, 1, 1]} : vector<12x16x4xf32> to vector<10x16x4xf32>
    %21 = vector.extract_strided_slice %19 {offsets = [1, 0, 0], sizes = [10, 16, 4], strides = [1, 1, 1]} : vector<12x16x4xf32> to vector<10x16x4xf32>
    %22 = arith.maximumf %20, %21 : vector<10x16x4xf32>
    %23 = vector.extract_strided_slice %19 {offsets = [2, 0, 0], sizes = [10, 16, 4], strides = [1, 1, 1]} : vector<12x16x4xf32> to vector<10x16x4xf32>
    %24 = arith.maximumf %22, %23 : vector<10x16x4xf32>
    %cst_16 = arith.constant 0xFF800000 : f32
    %25 = vector.broadcast %cst_16 : f32 to vector<10x1x4xf32>
    %26 = vector.extract_strided_slice %24 {offsets = [0, 0, 0], sizes = [10, 15, 4], strides = [1, 1, 1]} : vector<10x16x4xf32> to vector<10x15x4xf32>
    %27 = tpu.concatenate %25, %26 in 1 : vector<10x1x4xf32>, vector<10x15x4xf32> -> vector<10x16x4xf32>
    %28 = vector.extract_strided_slice %24 {offsets = [0, 1, 0], sizes = [10, 15, 4], strides = [1, 1, 1]} : vector<10x16x4xf32> to vector<10x15x4xf32>
    %29 = tpu.concatenate %28, %25 in 1 : vector<10x15x4xf32>, vector<10x1x4xf32> -> vector<10x16x4xf32>
    %30 = arith.maximumf %27, %24 : vector<10x16x4xf32>
    %31 = arith.maximumf %30, %29 : vector<10x16x4xf32>
    %32 = vector.extract_strided_slice %31 {offsets = [1, 0, 0], sizes = [8, 16, 4], strides = [1, 1, 1]} : vector<10x16x4xf32> to vector<8x16x4xf32>
    %33 = vector.shape_cast %32 : vector<8x16x4xf32> to vector<128x4xf32>
    %34 = arith.truncf %33 : vector<128x4xf32> to vector<128x4xbf16>
    %c1 = arith.constant 1 : index
    %c0_17 = arith.constant 0 : index
    %c0_18 = arith.constant 0 : index
    %35 = vector.load %arg2[%c1, %c0_17, %c0_18] : memref<3x4x4xbf16, #tpu.memory_space<vmem>>, vector<1x4x4xbf16>
    %36 = vector.shape_cast %35 : vector<1x4x4xbf16> to vector<4x4xbf16>
    %cst_19 = arith.constant dense<0.000000e+00> : vector<128x4xf32>
    %37 = tpu.matmul %34, %36, %cst_19 {dimension_numbers = #tpu.dot_dimension_numbers<[1], [0], [0], [1], [0, 0, 1, 1], [], []>} : vector<128x4xbf16>, vector<4x4xbf16>, vector<128x4xf32> -> vector<128x4xf32>
    %38 = arith.addf %6, %37 : vector<128x4xf32>
    %39 = vector.extract_strided_slice %31 {offsets = [0, 0, 0], sizes = [8, 16, 4], strides = [1, 1, 1]} : vector<10x16x4xf32> to vector<8x16x4xf32>
    %40 = vector.extract_strided_slice %31 {offsets = [1, 0, 0], sizes = [8, 16, 4], strides = [1, 1, 1]} : vector<10x16x4xf32> to vector<8x16x4xf32>
    %41 = arith.maximumf %39, %40 : vector<8x16x4xf32>
    %42 = vector.extract_strided_slice %31 {offsets = [2, 0, 0], sizes = [8, 16, 4], strides = [1, 1, 1]} : vector<10x16x4xf32> to vector<8x16x4xf32>
    %43 = arith.maximumf %41, %42 : vector<8x16x4xf32>
    %cst_20 = arith.constant 0xFF800000 : f32
    %44 = vector.broadcast %cst_20 : f32 to vector<8x1x4xf32>
    %45 = vector.extract_strided_slice %43 {offsets = [0, 0, 0], sizes = [8, 15, 4], strides = [1, 1, 1]} : vector<8x16x4xf32> to vector<8x15x4xf32>
    %46 = tpu.concatenate %44, %45 in 1 : vector<8x1x4xf32>, vector<8x15x4xf32> -> vector<8x16x4xf32>
    %47 = vector.extract_strided_slice %43 {offsets = [0, 1, 0], sizes = [8, 15, 4], strides = [1, 1, 1]} : vector<8x16x4xf32> to vector<8x15x4xf32>
    %48 = tpu.concatenate %47, %44 in 1 : vector<8x15x4xf32>, vector<8x1x4xf32> -> vector<8x16x4xf32>
    %49 = arith.maximumf %46, %43 : vector<8x16x4xf32>
    %50 = arith.maximumf %49, %48 : vector<8x16x4xf32>
    %51 = vector.shape_cast %50 : vector<8x16x4xf32> to vector<128x4xf32>
    %52 = arith.truncf %51 : vector<128x4xf32> to vector<128x4xbf16>
    %c2 = arith.constant 2 : index
    %c0_21 = arith.constant 0 : index
    %c0_22 = arith.constant 0 : index
    %53 = vector.load %arg2[%c2, %c0_21, %c0_22] : memref<3x4x4xbf16, #tpu.memory_space<vmem>>, vector<1x4x4xbf16>
    %54 = vector.shape_cast %53 : vector<1x4x4xbf16> to vector<4x4xbf16>
    %cst_23 = arith.constant dense<0.000000e+00> : vector<128x4xf32>
    %55 = tpu.matmul %52, %54, %cst_23 {dimension_numbers = #tpu.dot_dimension_numbers<[1], [0], [0], [1], [0, 0, 1, 1], [], []>} : vector<128x4xbf16>, vector<4x4xbf16>, vector<128x4xf32> -> vector<128x4xf32>
    %56 = arith.addf %38, %55 : vector<128x4xf32>
    %c0_24 = arith.constant 0 : index
    %c0_25 = arith.constant 0 : index
    %57 = vector.load %arg3[%c0_24, %c0_25] : memref<1x4xf32, #tpu.memory_space<vmem>>, vector<1x4xf32>
    %58 = vector.broadcast %57 : vector<1x4xf32> to vector<128x4xf32>
    %59 = arith.addf %56, %58 : vector<128x4xf32>
    %cst_26 = arith.constant 0.000000e+00 : f32
    %60 = vector.broadcast %cst_26 : f32 to vector<128x4xf32>
    %61 = arith.maximumf %59, %60 : vector<128x4xf32>
    %62 = vector.shape_cast %61 : vector<128x4xf32> to vector<8x16x4xf32>
    %c0_27 = arith.constant 0 : index
    %c0_28 = arith.constant 0 : index
    %c0_29 = arith.constant 0 : index
    %c0_30 = arith.constant 0 : index
    %63 = vector.load %arg7[%c0_27, %c0_28, %c0_29, %c0_30] : memref<1x8x16x4xf32, #tpu.memory_space<vmem>>, vector<1x8x16x4xf32>
    %64 = vector.shape_cast %63 : vector<1x8x16x4xf32> to vector<8x16x4xf32>
    %65 = vector.shape_cast %62 : vector<8x16x4xf32> to vector<1x8x16x4xf32>
    tpu.vector_store %arg7[%c0_27, %c0_28, %c0_29, %c0_30], %65 {strides = array<i32>} : memref<1x8x16x4xf32, #tpu.memory_space<vmem>>, vector<1x8x16x4xf32>,
    return
  }
  func.func @transform_0(%arg0: i32, %arg1: i32) -> (i32, i32, i32) {
    %c0_i32 = arith.constant 0 : i32
    %c0_i32_0 = arith.constant 0 : i32
    %c0_i32_1 = arith.constant 0 : i32
    %c0_i32_2 = arith.constant 0 : i32
    return %c0_i32, %c0_i32_0, %c0_i32_1 : i32, i32, i32
  }
  func.func @transform_1(%arg0: i32, %arg1: i32) -> (i32, i32) {
    %c0_i32 = arith.constant 0 : i32
    %c0_i32_0 = arith.constant 0 : i32
    %c0_i32_1 = arith.constant 0 : i32
    return %c0_i32, %c0_i32_0 : i32, i32
  }
  func.func @transform_2(%arg0: i32, %arg1: i32) -> (i32, i32, i32, i32) {
    %c0_i32 = arith.constant 0 : i32
    %c0_i32_0 = arith.constant 0 : i32
    %c0_i32_1 = arith.constant 0 : i32
    return %arg0, %arg1, %c0_i32, %c0_i32_0 : i32, i32, i32, i32
  }
  func.func @transform_3(%arg0: i32, %arg1: i32) -> (i32, i32, i32, i32) {
    %c4_i32 = arith.constant 4 : i32
    %0 = arith.muli %arg1, %c4_i32 : i32
    %c1_i32 = arith.constant 1 : i32
    %1 = arith.subi %0, %c1_i32 : i32
    %c0_i32 = arith.constant 0 : i32
    %2 = arith.maxsi %1, %c0_i32 : i32
    %c0_i32_0 = arith.constant 0 : i32
    %c0_i32_1 = arith.constant 0 : i32
    %c0_i32_2 = arith.constant 0 : i32
    return %arg0, %2, %c0_i32_0, %c0_i32_1 : i32, i32, i32, i32
  }
  func.func @transform_4(%arg0: i32, %arg1: i32) -> (i32, i32, i32, i32) {
    %c1_i32 = arith.constant 1 : i32
    %0 = arith.addi %arg1, %c1_i32 : i32
    %c4_i32 = arith.constant 4 : i32
    %1 = arith.muli %0, %c4_i32 : i32
    %c7_i32 = arith.constant 7 : i32
    %2 = arith.minsi %1, %c7_i32 : i32
    %c0_i32 = arith.constant 0 : i32
    %c0_i32_0 = arith.constant 0 : i32
    %c0_i32_1 = arith.constant 0 : i32
    return %arg0, %2, %c0_i32, %c0_i32_0 : i32, i32, i32, i32
  }
  func.func @transform_5(%arg0: i32, %arg1: i32) -> (i32, i32, i32, i32) {
    %c0_i32 = arith.constant 0 : i32
    %c0_i32_0 = arith.constant 0 : i32
    %c0_i32_1 = arith.constant 0 : i32
    return %arg0, %arg1, %c0_i32, %c0_i32_0 : i32, i32, i32, i32
  }
}

</mosaic_0001>

<bundles_post_ra>
// kernel: tpu_custom_call.1
= control target key start
LH: loop header
LB: loop body
LE: loop exit
PB: predicated region body
PF: predicated region fallthrough
CT: control target
= control target key end

     0   :  { %s1751_s18 = smov 0   ;;  %s1753_s19 = smov 0   ;;  %s2270_s0 = inlined_call_operand.vmem [shape: bf16[3,4,4], index: 0, kind: input, shape index: {}]   ;;  %s2271_s1 = inlined_call_operand.vmem [shape: f32[1,4], index: 1, kind: input, shape index: {}]   ;;  %s2272_s2 = inlined_call_operand.vmem [shape: f32[2,16,16,4], index: 2, kind: input, shape index: {}]   ;;  %s2273_s3 = inlined_call_operand.vmem [shape: f32[2,16,16,4], index: 3, kind: input, shape index: {}]   ;;  %s2274_s4 = inlined_call_operand.vmem [shape: f32[2,16,16,4], index: 4, kind: input, shape index: {}]   ;;  %s2275_s5 = inlined_call_operand.vmem [shape: f32[2,16,16,4], index: 5, kind: output, shape index: {}]  }
   0x1   :  { %s1755_s20 = smov 0   ;;  %s1757_s21 = smov 0  }
   0x2   :  { %s1759_s22 = smov 0  }
   0x3 LB: > { %s24_s23 = sadd.s32 1, %s1711_s20  ;;  %s27_s24 = sadd.s32 1, %s1715_s21  ;;  %s1719_s22 = sphi %s1759_s22, %s15_s22   ;;  %s1715_s21 = sphi %s1757_s21, %s2283_s21   ;;  %s1711_s20 = sphi %s1755_s20, %s2282_s20   ;;  %s1707_s19 = sphi %s1753_s19, %s2281_s19   ;;  %s1703_s18 = sphi %s1751_s18, %s2280_s18  }
   0x4   : > { %p25_p0 = scmp.ge.s32.totalorder %s24_s23, 2  ;;  %p1467_p1 = scmp.ge.s32.totalorder %s1719_s22, 1 }
   0x5   : > { %p277_p2 = scmp.lt.s32.totalorder %s1719_s22, 5 }
   0x6   : > { %s2285_s23 = smov (%p25_p0, %s24_s23), 0  ;;  %s2287_s24 = smov (!%p25_p0, %s27_s24), %s1715_s21 }
   0x7   : > { %p278_p3 = pnand %p1467_p1, %p277_p2  ;;  %p29_p4 = scmp.ge.s32.totalorder %s2287_s24, 2 }
   0x8   : > { %v428_v0 = vld [vmem:[%s2270_s0] sm:$0x3] (!%p278_p3)  ;;  %vm710_vm0 = vcmask (!%p278_p3), 1041408   ;;  %s1468_s27 = sshll.u32 (!%p278_p3), %s1703_s18, 3  ;;  %p344_p5 = scmp.lt.s32.totalorder (!%p278_p3), %s1707_s19, 1  ;;  %vm513_vm1 = vcmask (!%p278_p3), 1040384  }
   0x9   : > { %s2289_s24 = smov (%p29_p4, %s2287_s24), 0  ;;  %281 = sbr.rel (%p278_p3) target bundleno = 333 (0x14d), region = 40 }
   0xa   : > { %1638 = vmatprep.subr.msk.bf16.mxu0 (!%p278_p3), %vm710_vm0, %v428_v0  ;;  %v1789_v1 = vsel (!%p278_p3), %vm710_vm0, %v428_v0, 0  ;;  %p346_p6 = scmp.lt.s32.totalorder (!%p278_p3), %s1468_s27, 15  ;;  %s1472_s28 = sshll.u32 (!%p278_p3), %s1703_s18, 2  ;;  %v1487_v2 = vld [vmem:[%s2270_s0 + $0x2] sm:$0x3] (!%p278_p3)  ;;  %vm685_vm2 = vcmask (!%p278_p3), 31744  }
   0xb   : > { %1568 = vmatpush3.bf16.msra.mxu0 (!%p278_p3), %v1789_v1  ;;  %v1504_v3 = vld [vmem:[%s2270_s0 + $0x4] sm:$0x3] (!%p278_p3)  ;;  %1637 = vmatprep.subr.msk.bf16.mxu1 (!%p278_p3), %vm710_vm0, %v1487_v2  ;;  %v712_v4 = vsel (!%p278_p3), %vm710_vm0, %v1487_v2, 0  ;;  %s1473_s9 = sadd.s32 (!%p278_p3), 4294967295, %s1472_s28  ;;  %vm574_vm3 = vcmask (!%p278_p3), 1046528   ;;  %p429_p9 = scmp.eq.s32.totalorder (!%p278_p3), %s1703_s18, 0 }
   0xc   : > { %1640 = vmatprep.subr.msk.bf16.mxu0 (!%p278_p3), %vm710_vm0, %v1504_v3  ;;  %1550 = vmatpush3.bf16.msra.mxu1 (!%p278_p3), %v712_v4  ;;  %p356_p7 = scmp.gt.s32.totalorder (!%p278_p3), %s1473_s9, 0  ;;  %v1146_v13 = vsel (!%p278_p3), %vm710_vm0, %v1504_v3, 0  ;;  %s1924_s7 = sadd.s32 (!%p278_p3), 4, %s1472_s28 }
   0xd   : > { %1639 = vmatprep.subr.msk.bf16.mxu1 (!%p278_p3), %vm710_vm0, %v428_v0  ;;  %p375_p10 = scmp.lt.s32.totalorder (!%p278_p3), %s1924_s7, 7  ;;  %p441_p12 = scmp.eq.s32.totalorder (!%p278_p3), %s1703_s18, 1 }
  0x10   : > { %s2291_s19 = smov (!%p344_p5, %s1707_s19), 1  ;;  %s2293_s27 = smov (!%p346_p6, %s1468_s27), 15 }
  0x11   : > { %s1802_s8 = sshll.u32 %s2291_s19, 5  ;;  %s1469_s10 = sshll.u32 %s2293_s27, 1 }
  0x12   : > { %s1808_s11 = sadd.s32 %s1802_s8, %s1469_s10  ;;  %s2295_s9 = smov (!%p356_p7, %s1473_s9), 0 }
  0x13   : > { %s1471_s12 = sshll.u32 %s1808_s11, 3  ;;  %s1474_s16 = sshll.u32 %s2295_s9, 1 }
  0x14   : > { %s1816_s15 = scalar_lea.vmem %s2272_s2, %s1471_s12  ;;  %p1850_p8 = scmp.lt.s32.totalorder %s1474_s16, 15 }
  0x15   : > { %v1821_v5 = vld [vmem:[%s1816_s15] sm:$0xff]  ;;  %v1824_v6 = vld [vmem:[%s1816_s15 + $0x8] sm:$0xff]  ;;  %v1827_v7 = vld [vmem:[%s1816_s15 + $0x10] sm:$0xff]  ;;  %s430_s6 = scalar_select %p429_p9, 1, 0 }
  0x16   : > { %v1830_v8 = vld [vmem:[%s1816_s15 + $0x18] sm:$0xff]  ;;  %v408_v9 = vld [vmem:[%s1816_s15 + $0x20] sm:$0xff]  ;;  %v409_v10 = vld [vmem:[%s1816_s15 + $0x28] sm:$0xff]  ;;  %v420_v11 = vpack.c.bf16 %v1824_v6, %v1821_v5  ;;  %v457_v12 = vmax.f32 %v1821_v5, %v1827_v7  ;;  %s2297_s16 = smov (!%p1850_p8, %s1474_s16), 15  ;;  %s2299_s7 = smov (!%p375_p10, %s1924_s7), 7 }
  0x17   : > { %v458_v14 = vmax.f32 %v1824_v6, %v1830_v8  ;;  %v421_v15 = vpack.c.bf16 %v1830_v8, %v1827_v7  ;;  %v422_v16 = vpack.c.bf16 %v409_v10, %v408_v9  ;;  %v410_v17 = vld [vmem:[%s1816_s15 + $0x30] sm:$0xff]  ;;  %v411_v18 = vld [vmem:[%s1816_s15 + $0x38] sm:$0xff]  ;;  %v1847_v19 = vld [vmem:[%s1816_s15 + $0x40] sm:$0xff]  ;;  %v459_v20 = vmax.f32 %v1827_v7, %v408_v9  ;;  %s1475_s19 = sshll.u32 %s2297_s16, 1  ;;  %s1479_s28 = sshll.u32 %s2299_s7, 1 }
  0x18   : > { %v477_v21 = vmax.f32 %v457_v12, %v408_v9  ;;  %1569 = vmatprep.mubr.msk.bf16.mxu0 %vm685_vm2, %v420_v11  ;;  %v1856_v22 = vld [vmem:[%s1816_s15 + $0x48] sm:$0xff]  ;;  %v423_v23 = vpack.c.bf16 %v411_v18, %v410_v17  ;;  %v460_v24 = vmax.f32 %v1830_v8, %v409_v10  ;;  %v461_v25 = vmax.f32 %v408_v9, %v410_v17  ;;  %v1861_v27 = vld [vmem:[%s1816_s15 + $0x50] sm:$0xff]  ;;  %v1864_v28 = vld [vmem:[%s1816_s15 + $0x58] sm:$0xff]  ;;  %s365_s25 = sadd.s32 %s1475_s19, %s1802_s8  ;;  %p1987_p11 = scmp.lt.s32.totalorder %s1479_s28, 15 }
  0x19   : > { %v478_v26 = vmax.f32 %v458_v14, %v409_v10  ;;  %1570 = vmatmul.mubr.msk.bf16.vlgmr.msra.gmra.mrb[0].mxu0 %vm685_vm2, %v421_v15  ;;  %v462_v29 = vmax.f32 %v409_v10, %v411_v18  ;;  %v463_v30 = vmax.f32 %v410_v17, %v1847_v19  ;;  %v464_v31 = vmax.f32 %v411_v18, %v1856_v22  ;;  %s1477_s26 = sshll.u32 %s365_s25, 3  ;;  %s2206_s27 = scalar_lea.vmem %s2275_s5, %s1471_s12 }
  0x1a   : > { %v520_v32 = vrot.slane %v477_v21, 7  ;;  %v581_v33 = vrot.slane %v477_v21, 1  ;;  %1586 = vmatpush3.bf16.msra.mxu0 %v1146_v13  ;;  %1573 = vmatprep.mubr.msk.bf16.mxu0 %vm685_vm2, %v422_v16  ;;  %v465_v34 = vmax.f32 %v1847_v19, %v1861_v27  ;;  %v466_v35 = vmax.f32 %v1856_v22, %v1864_v28  ;;  %s367_s30 = scalar_lea.vmem %s2273_s3, %s1477_s26  ;;  %s2301_s28 = smov (!%p1987_p11, %s1479_s28), 15 }
  0x1b   : > { %v521_v36 = vrot.slane %v478_v26, 7  ;;  %v582_v37 = vrot.slane %v478_v26, 1  ;;  %v479_v38 = vmax.f32 %v459_v20, %v410_v17  ;;  %v480_v39 = vmax.f32 %v460_v24, %v411_v18  ;;  %v433_v60 = vld [vmem:[%s367_s30] sm:$0xff]  ;;  %v434_v2 = vld [vmem:[%s367_s30 + $0x8] sm:$0xff]  ;;  %v435_v3 = vld [vmem:[%s367_s30 + $0x10] sm:$0xff]  ;;  %s1480_s10 = sshll.u32 %s2301_s28, 1 }
  0x1c   : > { %v566_v40 = vsel %vm513_vm1, -inf, %v520_v32  ;;  %v1877_v41 = vmax.f32 %v461_v25, %v1847_v19  ;;  %v1880_v42 = vmax.f32 %v462_v29, %v1856_v22  ;;  %v1883_v43 = vmax.f32 %v463_v30, %v1861_v27  ;;  %v436_v4 = vld [vmem:[%s367_s30 + $0x18] sm:$0xff]  ;;  %s2041_s13 = sadd.s32 %s1480_s10, %s1802_s8 }
  0x1d   : > { %v522_v44 = vsel %vm513_vm1, %v520_v32, %v521_v36  ;;  %v583_v45 = vsel %vm574_vm3, %v581_v33, %v582_v37  ;;  %v627_v46 = vsel %vm574_vm3, %v582_v37, -inf  ;;  %v639_v47 = vmax.f32 %v566_v40, %v477_v21  ;;  %s1482_s8 = sshll.u32 %s2041_s13, 3 }
  0x1e   : > { %v640_v48 = vmax.f32 %v522_v44, %v478_v26  ;;  %v1891_v49 = vmax.f32 %v464_v31, %v1864_v28  ;;  %v523_v50 = vrot.slane %v479_v38, 7  ;;  %v524_v51 = vrot.slane %v480_v39, 7  ;;  %s386_s17 = scalar_lea.vmem %s2274_s4, %s1482_s8 }
  0x1f   : > { %v1896_v52 = vmax.f32 %v639_v47, %v583_v45  ;;  %v527_v53 = vrot.slane %v1880_v42, 7  ;;  %v584_v54 = vrot.slane %v479_v38, 1  ;;  %v585_v55 = vrot.slane %v480_v39, 1 }
  0x20   : > { %v1899_v56 = vmax.f32 %v640_v48, %v627_v46  ;;  %v530_v57 = vrot.slane %v1891_v49, 7  ;;  %v525_v58 = vsel %vm513_vm1, %v523_v50, %v524_v51  ;;  %v567_v59 = vsel %vm513_vm1, -inf, %v523_v50 }
  0x21   : > { %1574 = vmatmul.mubr.msk.bf16.gmra.mrb[4].mxu0 %vm685_vm2, %v423_v23  ;;  %v586_v61 = vsel %vm574_vm3, %v584_v54, %v585_v55  ;;  %v628_v62 = vsel %vm574_vm3, %v585_v55, -inf  ;;  %v641_v63 = vmax.f32 %v567_v59, %v479_v38  ;;  %v642_v0 = vmax.f32 %v525_v58, %v480_v39 }
  0x22   : > { %v676_v9 = vpack.c.bf16 %v1899_v56, %v1896_v52  ;;  %v526_v10 = vrot.slane %v1877_v41, 7  ;;  %v587_v11 = vrot.slane %v1877_v41, 1  ;;  %v588_v12 = vrot.slane %v1880_v42, 1 }
  0x23   : > { %v431_v13 = vstv %s430_s6  ;;  %v1914_v14 = vmax.f32 %v641_v63, %v586_v61  ;;  %v1916_v15 = vmax.f32 %v642_v0, %v628_v62  ;;  %v529_v16 = vrot.slane %v1883_v43, 7 }
  0x24   : > { %vm432_vm4 = vcmp.eq.s32.totalorder %v431_v13, 1  ;;  %v528_v17 = vsel %vm513_vm1, %v526_v10, %v527_v53  ;;  %v568_v18 = vsel %vm513_vm1, -inf, %v526_v10  ;;  %v589_v20 = vsel %vm574_vm3, %v587_v11, %v588_v12 }
  0x25   : > { %v437_v21 = vsel %vm432_vm4, -inf, %v433_v60  ;;  %v438_v23 = vsel %vm432_vm4, -inf, %v434_v2  ;;  %v439_v24 = vsel %vm432_vm4, -inf, %v435_v3  ;;  %v440_v25 = vsel %vm432_vm4, -inf, %v436_v4  ;;  %v1958_v3 = vld [vmem:[%s1816_s15 + $0x60] sm:$0xff]  ;;  %v1961_v4 = vld [vmem:[%s1816_s15 + $0x68] sm:$0xff] }
  0x26   : > { %v453_v26 = vmax.f32 %v437_v21, %v439_v24  ;;  %v454_v29 = vmax.f32 %v438_v23, %v440_v25  ;;  %v455_v30 = vmax.f32 %v439_v24, %v1821_v5  ;;  %v456_v31 = vmax.f32 %v440_v25, %v1824_v6 }
  0x27   : > { %v677_v32 = vpack.c.bf16 %v1916_v15, %v1914_v14  ;;  %v629_v33 = vsel %vm574_vm3, %v588_v12, -inf  ;;  %v643_v36 = vmax.f32 %v568_v18, %v1877_v41  ;;  %v644_v37 = vmax.f32 %v528_v17, %v1880_v42 }
  0x28   : > { %v473_v38 = vmax.f32 %v453_v26, %v1821_v5  ;;  %v474_v39 = vmax.f32 %v454_v29, %v1824_v6  ;;  %v475_v40 = vmax.f32 %v455_v30, %v1827_v7  ;;  %v476_v44 = vmax.f32 %v456_v31, %v1830_v8 }
  0x29   : > { %v1938_v45 = vmax.f32 %v643_v36, %v589_v20  ;;  %v1940_v46 = vmax.f32 %v644_v37, %v629_v33  ;;  %v531_v47 = vsel %vm513_vm1, %v529_v16, %v530_v57  ;;  %v569_v41 = vsel %vm513_vm1, -inf, %v529_v16 }
  0x2a   : > { %v514_v42 = vrot.slane %v473_v38, 7  ;;  %v515_v48 = vrot.slane %v474_v39, 7  ;;  %v575_v50 = vrot.slane %v473_v38, 1  ;;  %v576_v5 = vrot.slane %v474_v39, 1 }
  0x2b   : > { %v517_v51 = vrot.slane %v475_v40, 7  ;;  %v518_v53 = vrot.slane %v476_v44, 7  ;;  %v578_v6 = vrot.slane %v475_v40, 1  ;;  %v579_v7 = vrot.slane %v476_v44, 1 }
  0x2c   : > { %v516_v8 = vsel %vm513_vm1, %v514_v42, %v515_v48  ;;  %v564_v54 = vsel %vm513_vm1, -inf, %v514_v42  ;;  %v577_v55 = vsel %vm574_vm3, %v575_v50, %v576_v5  ;;  %v625_v57 = vsel %vm574_vm3, %v576_v5, -inf }
  0x2d   : > { %v635_v58 = vmax.f32 %v564_v54, %v473_v38  ;;  %v636_v59 = vmax.f32 %v516_v8, %v474_v39  ;;  %v519_v60 = vsel %vm513_vm1, %v517_v51, %v518_v53  ;;  %v565_v61 = vsel %vm513_vm1, -inf, %v517_v51 }
  0x2e   : > { %v580_v62 = vsel %vm574_vm3, %v578_v6, %v579_v7  ;;  %v626_v63 = vsel %vm574_vm3, %v579_v7, -inf  ;;  %v637_v0 = vmax.f32 %v565_v61, %v475_v40  ;;  %v638_v2 = vmax.f32 %v519_v60, %v476_v44 }
  0x2f   : > { %v655_v10 = vmax.f32 %v635_v58, %v577_v55  ;;  %v656_v11 = vmax.f32 %v636_v59, %v625_v57  ;;  %v678_v12 = vpack.c.bf16 %v1940_v46, %v1938_v45  ;;  %v590_v13 = vrot.slane %v1883_v43, 1 }
  0x30   : > { %v657_v16 = vmax.f32 %v637_v0, %v580_v62  ;;  %v658_v17 = vmax.f32 %v638_v2, %v626_v63  ;;  %v591_v18 = vrot.slane %v1891_v49, 1  ;;  %v645_v20 = vmax.f32 %v569_v41, %v1883_v43 }
  0x31   : > { %v646_v21 = vmax.f32 %v531_v47, %v1891_v49  ;;  %v1974_v23 = vmax.f32 %v465_v34, %v1958_v3  ;;  %v1980_v24 = vmax.f32 %v466_v35, %v1961_v4  ;;  %v939_v25 = vmax.f32 %v1896_v52, %v1914_v14 }
  0x32   : > { %v675_v26 = vpack.c.bf16 %v658_v17, %v657_v16  ;;  %v935_v29 = vmax.f32 %v655_v10, %v657_v16  ;;  %v936_v43 = vmax.f32 %v656_v11, %v658_v17  ;;  %v937_v49 = vmax.f32 %v657_v16, %v1896_v52 }
  0x33   : > { %v938_v34 = vmax.f32 %v658_v17, %v1899_v56  ;;  %v592_v30 = vsel %vm574_vm3, %v590_v13, %v591_v18  ;;  %v630_v35 = vsel %vm574_vm3, %v591_v18, -inf  ;;  %v532_v31 = vrot.slane %v1974_v23, 7 }
  0x34   : > { %1551 = vmatprep.mubr.msk.bf16.mxu1 %vm685_vm2, %v675_v26  ;;  %v951_v33 = vmax.f32 %v935_v29, %v1896_v52  ;;  %v952_v36 = vmax.f32 %v936_v43, %v1899_v56  ;;  %v953_v37 = vmax.f32 %v937_v49, %v1914_v14  ;;  %v1999_v38 = vmax.f32 %v645_v20, %v592_v30  ;;  %v2056_v49 = vld [vmem:[%s1816_s15 + $0x70] sm:$0xff] }
  0x35   : > { %1552 = vmatmul.mubr.msk.bf16.vlgmr.msra.gmra.mrb[0].mxu1 %vm685_vm2, %v676_v9  ;;  %v954_v39 = vmax.f32 %v938_v34, %v1916_v15  ;;  %v2006_v40 = vmax.f32 %v646_v21, %v630_v35  ;;  %v533_v44 = vrot.slane %v1980_v24, 7  ;;  %v570_v47 = vsel %vm513_vm1, -inf, %v532_v31 }
  0x36   : > { %1604 = vmatpush3.bf16.msra.mxu1 %v1789_v1  ;;  %1555 = vmatprep.mubr.msk.bf16.mxu1 %vm685_vm2, %v677_v32  ;;  %v983_v41 = vrot.slane %v951_v33, 7  ;;  %v984_v42 = vrot.slane %v952_v36, 7  ;;  %v1031_v52 = vrot.slane %v951_v33, 1  ;;  %v1032_v48 = vrot.slane %v952_v36, 1 }
  0x37   : > { %v986_v9 = vrot.slane %v953_v37, 7  ;;  %v987_v50 = vrot.slane %v954_v39, 7  ;;  %v1034_v5 = vrot.slane %v953_v37, 1  ;;  %v1035_v51 = vrot.slane %v954_v39, 1 }
  0x38   : > { %v985_v1 = vsel %vm513_vm1, %v983_v41, %v984_v42  ;;  %v1023_v53 = vsel %vm513_vm1, -inf, %v983_v41  ;;  %v1033_v6 = vsel %vm574_vm3, %v1031_v52, %v1032_v48  ;;  %v1071_v32 = vsel %vm574_vm3, %v1032_v48, -inf }
  0x39   : > { %v1079_v7 = vmax.f32 %v1023_v53, %v951_v33  ;;  %v1080_v8 = vmax.f32 %v985_v1, %v952_v36  ;;  %v988_v54 = vsel %vm513_vm1, %v986_v9, %v987_v50  ;;  %v1024_v55 = vsel %vm513_vm1, -inf, %v986_v9 }
  0x3a   : > { %v1036_v57 = vsel %vm574_vm3, %v1034_v5, %v1035_v51  ;;  %v1072_v58 = vsel %vm574_vm3, %v1035_v51, -inf  ;;  %v1081_v59 = vmax.f32 %v1024_v55, %v953_v37  ;;  %v1082_v60 = vmax.f32 %v988_v54, %v954_v39 }
  0x3b   : > { %v1095_v61 = vmax.f32 %v1079_v7, %v1033_v6  ;;  %v1096_v62 = vmax.f32 %v1080_v8, %v1071_v32  ;;  %v679_v63 = vpack.c.bf16 %v2006_v40, %v1999_v38  ;;  %v534_v0 = vsel %vm513_vm1, %v532_v31, %v533_v44  ;;  %v2071_v44 = vld [vmem:[%s1816_s15 + $0x78] sm:$0xff]  ;;  %s442_s15 = scalar_select %p441_p12, 1, 0 }
  0x3c   : > { %v1097_v2 = vmax.f32 %v1081_v59, %v1036_v57  ;;  %v1098_v10 = vmax.f32 %v1082_v60, %v1072_v58  ;;  %v593_v11 = vrot.slane %v1974_v23, 1  ;;  %v594_v13 = vrot.slane %v1980_v24, 1 }
  0x3d   : > { %1556 = vmatmul.mubr.msk.bf16.gmra.mrb[4].mxu1 %vm685_vm2, %v678_v12  ;;  %v1111_v16 = vpack.c.bf16 %v1096_v62, %v1095_v61  ;;  %v647_v17 = vmax.f32 %v570_v47, %v1974_v23  ;;  %v648_v18 = vmax.f32 %v534_v0, %v1980_v24  ;;  %v940_v20 = vmax.f32 %v1899_v56, %v1916_v15 }
  0x3e   : > { %v1112_v21 = vpack.c.bf16 %v1098_v10, %v1097_v2  ;;  %1559 = vmatprep.mubr.msk.bf16.mxu1 %vm685_vm2, %v679_v63  ;;  %v595_v26 = vsel %vm574_vm3, %v593_v11, %v594_v13  ;;  %v631_v29 = vsel %vm574_vm3, %v594_v13, -inf  ;;  %v955_v12 = vmax.f32 %v939_v25, %v1938_v45  ;;  %v445_v2 = vld [vmem:[%s386_s17] sm:$0xff] }
  0x3f   : > { %1587 = vmatprep.mubr.msk.bf16.mxu0 %vm685_vm2, %v1111_v16  ;;  %v2048_v23 = vmax.f32 %v647_v17, %v595_v26  ;;  %v2050_v24 = vmax.f32 %v648_v18, %v631_v29  ;;  %v956_v56 = vmax.f32 %v940_v20, %v1940_v46  ;;  %v941_v43 = vmax.f32 %v1914_v14, %v1938_v45  ;;  %v446_v17 = vld [vmem:[%s386_s17 + $0x8] sm:$0xff]  ;;  %v447_v18 = vld [vmem:[%s386_s17 + $0x10] sm:$0xff]  ;;  %v448_v20 = vld [vmem:[%s386_s17 + $0x18] sm:$0xff] }
  0x40   : > { %1588 = vmatmul.mubr.msk.bf16.vlgmr.msra.gmra.mrb[0].mxu0 %vm685_vm2, %v1112_v21  ;;  %v989_v34 = vrot.slane %v955_v12, 7  ;;  %v1037_v30 = vrot.slane %v955_v12, 1  ;;  %v942_v25 = vmax.f32 %v1916_v15, %v1940_v46  ;;  %v467_v35 = vmax.f32 %v1861_v27, %v1958_v3 }
  0x41   : > { %v680_v31 = vpack.c.bf16 %v2050_v24, %v2048_v23  ;;  %v990_v33 = vrot.slane %v956_v56, 7  ;;  %v1038_v36 = vrot.slane %v956_v56, 1  ;;  %v957_v14 = vmax.f32 %v941_v43, %v1999_v38 }
  0x42   : > { %v1025_v37 = vsel %vm513_vm1, -inf, %v989_v34  ;;  %v958_v39 = vmax.f32 %v942_v25, %v2006_v40  ;;  %v468_v15 = vmax.f32 %v1864_v28, %v1961_v4  ;;  %v487_v47 = vmax.f32 %v467_v35, %v2056_v49 }
  0x43   : > { %v991_v41 = vsel %vm513_vm1, %v989_v34, %v990_v33  ;;  %v1039_v42 = vsel %vm574_vm3, %v1037_v30, %v1038_v36  ;;  %v1073_v52 = vsel %vm574_vm3, %v1038_v36, -inf  ;;  %v1083_v48 = vmax.f32 %v1025_v37, %v955_v12 }
  0x44   : > { %v1084_v9 = vmax.f32 %v991_v41, %v956_v56  ;;  %v992_v50 = vrot.slane %v957_v14, 7  ;;  %v993_v5 = vrot.slane %v958_v39, 7  ;;  %v1040_v51 = vrot.slane %v957_v14, 1 }
  0x45   : > { %1560 = vmatmul.mubr.msk.bf16.gmra.mrb[8].mxu1 %vm685_vm2, %v680_v31  ;;  %v1099_v1 = vmax.f32 %v1083_v48, %v1039_v42  ;;  %v1041_v53 = vrot.slane %v958_v39, 1  ;;  %v488_v6 = vmax.f32 %v468_v15, %v2071_v44  ;;  %v535_v32 = vrot.slane %v487_v47, 7 }
  0x46   : > { %v1100_v7 = vmax.f32 %v1084_v9, %v1073_v52  ;;  %v994_v8 = vsel %vm513_vm1, %v992_v50, %v993_v5  ;;  %v1026_v54 = vsel %vm513_vm1, -inf, %v992_v50  ;;  %v596_v55 = vrot.slane %v487_v47, 1 }
  0x47   : > { %v1042_v57 = vsel %vm574_vm3, %v1040_v51, %v1041_v53  ;;  %v1074_v58 = vsel %vm574_vm3, %v1041_v53, -inf  ;;  %v1085_v59 = vmax.f32 %v1026_v54, %v957_v14  ;;  %v1086_v60 = vmax.f32 %v994_v8, %v958_v39 }
  0x48   : > { %v1113_v61 = vpack.c.bf16 %v1100_v7, %v1099_v1  ;;  %v536_v62 = vrot.slane %v488_v6, 7  ;;  %v571_v63 = vsel %vm513_vm1, -inf, %v535_v32  ;;  %v597_v0 = vrot.slane %v488_v6, 1 }
  0x49   : > { %v1101_v10 = vmax.f32 %v1085_v59, %v1042_v57  ;;  %v1102_v11 = vmax.f32 %v1086_v60, %v1074_v58  ;;  %v649_v13 = vmax.f32 %v571_v63, %v487_v47  ;;  %v443_v16 = vstv %s442_s15 }
  0x4a   : > { %1591 = vmatprep.mubr.msk.bf16.mxu0 %vm685_vm2, %v1113_v61  ;;  %v537_v21 = vsel %vm513_vm1, %v535_v32, %v536_v62  ;;  %v598_v26 = vsel %vm574_vm3, %v596_v55, %v597_v0  ;;  %v632_v29 = vsel %vm574_vm3, %v597_v0, -inf  ;;  %vm2095_vm5 = vcmp.eq.s32.totalorder %v443_v16, 1 }
  0x4b   : > { %v1114_v56 = vpack.c.bf16 %v1102_v11, %v1101_v10  ;;  %v650_v43 = vmax.f32 %v537_v21, %v488_v6  ;;  %v2099_v34 = vmax.f32 %v649_v13, %v598_v26  ;;  %v449_v30 = vsel %vm2095_vm5, -inf, %v445_v2 }
  0x4c   : > { %v450_v25 = vsel %vm2095_vm5, -inf, %v446_v17  ;;  %v451_v35 = vsel %vm2095_vm5, -inf, %v447_v18  ;;  %v452_v31 = vsel %vm2095_vm5, -inf, %v448_v20  ;;  %v469_v33 = vmax.f32 %v1958_v3, %v2056_v49 }
  0x4d   : > { %1592 = vmatmul.mubr.msk.bf16.gmra.mrb[4].mxu0 %vm685_vm2, %v1114_v56  ;;  %v2112_v36 = vmax.f32 %v650_v43, %v632_v29  ;;  %v470_v14 = vmax.f32 %v1961_v4, %v2071_v44  ;;  %v471_v37 = vmax.f32 %v2056_v49, %v449_v30  ;;  %v472_v39 = vmax.f32 %v2071_v44, %v450_v25 }
  0x4e   : > { %v489_v15 = vmax.f32 %v469_v33, %v449_v30  ;;  %v943_v47 = vmax.f32 %v1938_v45, %v1999_v38  ;;  %v944_v41 = vmax.f32 %v1940_v46, %v2006_v40  ;;  %v945_v42 = vmax.f32 %v1999_v38, %v2048_v23 }
  0x4f   : > { %v681_v52 = vpack.c.bf16 %v2112_v36, %v2099_v34  ;;  %v490_v48 = vmax.f32 %v470_v14, %v450_v25  ;;  %v2126_v9 = vmax.f32 %v471_v37, %v451_v35  ;;  %v2128_v50 = vmax.f32 %v472_v39, %v452_v31 }
  0x50   : > { %v538_v5 = vrot.slane %v489_v15, 7  ;;  %v599_v51 = vrot.slane %v489_v15, 1  ;;  %v959_v1 = vmax.f32 %v943_v47, %v2048_v23  ;;  %v960_v45 = vmax.f32 %v944_v41, %v2050_v24 }
  0x51   : > { %1563 = vmatprep.mubr.msk.bf16.mxu1 %vm685_vm2, %v681_v52  ;;  %v539_v46 = vrot.slane %v490_v48, 7  ;;  %v600_v53 = vrot.slane %v490_v48, 1  ;;  %v946_v38 = vmax.f32 %v2006_v40, %v2050_v24  ;;  %v961_v6 = vmax.f32 %v945_v42, %v2099_v34 }
  0x52   : > { %v572_v32 = vsel %vm513_vm1, -inf, %v538_v5  ;;  %v995_v7 = vrot.slane %v959_v1, 7  ;;  %v996_v8 = vrot.slane %v960_v45, 7  ;;  %v1043_v54 = vrot.slane %v959_v1, 1 }
  0x53   : > { %v540_v55 = vsel %vm513_vm1, %v538_v5, %v539_v46  ;;  %v601_v57 = vsel %vm574_vm3, %v599_v51, %v600_v53  ;;  %v633_v58 = vsel %vm574_vm3, %v600_v53, -inf  ;;  %v651_v59 = vmax.f32 %v572_v32, %v489_v15 }
  0x54   : > { %v652_v60 = vmax.f32 %v540_v55, %v490_v48  ;;  %v997_v61 = vsel %vm513_vm1, %v995_v7, %v996_v8  ;;  %v1027_v62 = vsel %vm513_vm1, -inf, %v995_v7  ;;  %v1044_v40 = vrot.slane %v960_v45, 1 }
  0x55   : > { %v2142_v63 = vmax.f32 %v651_v59, %v601_v57  ;;  %v1087_v0 = vmax.f32 %v1027_v62, %v959_v1  ;;  %v1088_v2 = vmax.f32 %v997_v61, %v960_v45  ;;  %v962_v10 = vmax.f32 %v946_v38, %v2112_v36 }
  0x56   : > { %v672_v11 = vmax.f32 %v652_v60, %v633_v58  ;;  %v1045_v13 = vsel %vm574_vm3, %v1043_v54, %v1044_v40  ;;  %v1075_v16 = vsel %vm574_vm3, %v1044_v40, -inf  ;;  %v998_v17 = vrot.slane %v961_v6, 7 }
  0x57   : > { %v949_v18 = vmax.f32 %v2099_v34, %v2142_v63  ;;  %v1103_v20 = vmax.f32 %v1087_v0, %v1045_v13  ;;  %v1104_v21 = vmax.f32 %v1088_v2, %v1075_v16  ;;  %v999_v26 = vrot.slane %v962_v10, 7 }
  0x58   : > { %v682_v29 = vpack.c.bf16 %v672_v11, %v2142_v63  ;;  %v950_v12 = vmax.f32 %v2112_v36, %v672_v11  ;;  %v1028_v56 = vsel %vm513_vm1, -inf, %v998_v17  ;;  %v1046_v43 = vrot.slane %v961_v6, 1 }
  0x59   : > { %v1115_v30 = vpack.c.bf16 %v1104_v21, %v1103_v20  ;;  %v1000_v25 = vsel %vm513_vm1, %v998_v17, %v999_v26  ;;  %v1047_v35 = vrot.slane %v962_v10, 1  ;;  %v1089_v31 = vmax.f32 %v1028_v56, %v961_v6 }
  0x5a   : > { %1564 = vmatmul.mubr.msk.bf16.gmra.mrb[12].mxu1 %vm685_vm2, %v682_v29  ;;  %v1090_v33 = vmax.f32 %v1000_v25, %v962_v10  ;;  %v424_v14 = vpack.c.bf16 %v1856_v22, %v1847_v19  ;;  %v425_v37 = vpack.c.bf16 %v1864_v28, %v1861_v27  ;;  %v947_v39 = vmax.f32 %v2048_v23, %v2099_v34 }
  0x5b   : > { %1595 = vmatprep.mubr.msk.bf16.mxu0 %vm685_vm2, %v1115_v30  ;;  %v1048_v15 = vsel %vm574_vm3, %v1046_v43, %v1047_v35  ;;  %v1076_v47 = vsel %vm574_vm3, %v1047_v35, -inf  ;;  %v948_v41 = vmax.f32 %v2050_v24, %v2112_v36  ;;  %v541_v42 = vrot.slane %v2126_v9, 7 }
  0x5c   : > { %v1105_v52 = vmax.f32 %v1089_v31, %v1048_v15  ;;  %v1106_v48 = vmax.f32 %v1090_v33, %v1076_v47  ;;  %1577 = vmatprep.mubr.msk.bf16.mxu1 %vm685_vm2, %v424_v14  ;;  %v963_v19 = vmax.f32 %v947_v39, %v2142_v63  ;;  %v542_v22 = vrot.slane %v2128_v50, 7  ;;  %v2198_v31 = vld [vmem:[%s2271_s1] ss:$0 sm:$0xff] }
  0x5d   : > { %v964_v27 = vmax.f32 %v948_v41, %v672_v11  ;;  %v573_v28 = vsel %vm513_vm1, -inf, %v541_v42  ;;  %v602_v23 = vrot.slane %v2126_v9, 1  ;;  %v603_v34 = vrot.slane %v2128_v50, 1 }
  0x5e   : > { %v1116_v5 = vpack.c.bf16 %v1106_v48, %v1105_v52  ;;  %v1001_v51 = vrot.slane %v963_v19, 7  ;;  %v1049_v24 = vrot.slane %v963_v19, 1  ;;  %v543_v36 = vsel %vm513_vm1, %v541_v42, %v542_v22 }
  0x5f   : > { %v1002_v1 = vrot.slane %v964_v27, 7  ;;  %v1050_v45 = vrot.slane %v964_v27, 1  ;;  %v604_v46 = vsel %vm574_vm3, %v602_v23, %v603_v34  ;;  %v634_v53 = vsel %vm574_vm3, %v603_v34, -inf }
  0x60   : > { %1596 = vmatmul.mubr.msk.bf16.gmra.mrb[8].mxu0 %vm685_vm2, %v1116_v5  ;;  %v1029_v38 = vsel %vm513_vm1, -inf, %v1001_v51  ;;  %v653_v6 = vmax.f32 %v573_v28, %v2126_v9  ;;  %v654_v32 = vmax.f32 %v543_v36, %v2128_v50  ;;  %v426_v7 = vpack.c.bf16 %v1961_v4, %v1958_v3 }
  0x61   : > { %v1003_v8 = vsel %vm513_vm1, %v1001_v51, %v1002_v1  ;;  %v1051_v54 = vsel %vm574_vm3, %v1049_v24, %v1050_v45  ;;  %v1077_v55 = vsel %vm574_vm3, %v1050_v45, -inf  ;;  %v1091_v57 = vmax.f32 %v1029_v38, %v963_v19 }
  0x62   : > { %1578 = vmatmul.mubr.msk.bf16.vlgmr.msra.gmra.mrb[8].mxu1 %vm685_vm2, %v425_v37  ;;  %v1092_v58 = vmax.f32 %v1003_v8, %v964_v27  ;;  %v673_v59 = vmax.f32 %v653_v6, %v604_v46  ;;  %v674_v60 = vmax.f32 %v654_v32, %v634_v53  ;;  %v427_v3 = vpack.c.bf16 %v2071_v44, %v2056_v49 }
  0x63   : > { %v1107_v61 = vmax.f32 %v1091_v57, %v1051_v54  ;;  %1581 = vmatprep.mubr.msk.bf16.mxu1 %vm685_vm2, %v426_v7 }
  0x64   : > { %v1108_v9 = vmax.f32 %v1092_v58, %v1077_v55  ;;  %v965_v50 = vmax.f32 %v949_v18, %v673_v59  ;;  %v966_v62 = vmax.f32 %v950_v12, %v674_v60 }
  0x66   : > { %v1117_v4 = vpack.c.bf16 %v1108_v9, %v1107_v61  ;;  %v1004_v40 = vrot.slane %v965_v50, 7  ;;  %v1005_v63 = vrot.slane %v966_v62, 7  ;;  %v1052_v0 = vrot.slane %v965_v50, 1 }
  0x67   : > { %v1053_v2 = vrot.slane %v966_v62, 1 }
  0x68   : > { %1599 = vmatprep.mubr.msk.bf16.mxu0 %vm685_vm2, %v1117_v4  ;;  %v1006_v10 = vsel %vm513_vm1, %v1004_v40, %v1005_v63  ;;  %v1030_v11 = vsel %vm513_vm1, -inf, %v1004_v40 }
  0x69   : > { %v1054_v13 = vsel %vm574_vm3, %v1052_v0, %v1053_v2  ;;  %v1078_v16 = vsel %vm574_vm3, %v1053_v2, -inf  ;;  %v1093_v17 = vmax.f32 %v1030_v11, %v965_v50  ;;  %v1094_v18 = vmax.f32 %v1006_v10, %v966_v62 }
  0x6a   : > { %1582 = vmatmul.mubr.msk.bf16.gmra.mrb[12].mxu1 %vm685_vm2, %v427_v3 }
  0x6b   : > { %v1109_v49 = vmax.f32 %v1093_v17, %v1054_v13  ;;  %v1110_v44 = vmax.f32 %v1094_v18, %v1078_v16 }
  0x6d   : > { %v1118_v20 = vpack.c.bf16 %v1110_v44, %v1109_v49 }
  0x6f   : > { %1600 = vmatmul.mubr.msk.bf16.gmra.mrb[12].mxu0 %vm685_vm2, %v1118_v20 }
 0x108   : > { %v1553_v21 = vpop.f32.mrb[0].mxu1 }
 0x109   : > { %v748_v26 = vpop.f32.mrb[1].mxu1 }
 0x10a   : > { %v1554_v29 = vpop.f32.mrb[2].mxu1 }
 0x10b   : > { %v751_v12 = vpop.f32.mrb[3].mxu1 }
 0x110   : > { %v1557_v56 = vpop.f32.mrb[4].mxu1 }
 0x111   : > { %v764_v43 = vpop.f32.mrb[5].mxu1 }
 0x112   : > { %v1558_v30 = vpop.f32.mrb[6].mxu1 }
 0x113   : > { %v767_v25 = vpop.f32.mrb[7].mxu1  ;;  %v1589_v35 = vpop.f32.mrb[0].mxu0 }
 0x114   : > { %v1605_v33 = vadd.f32 %v1589_v35, %v1553_v21  ;;  %v1182_v14 = vpop.f32.mrb[1].mxu0 }
 0x115   : > { %v1606_v37 = vadd.f32 %v1182_v14, %v748_v26  ;;  %v1590_v39 = vpop.f32.mrb[2].mxu0 }
 0x116   : > { %v1270_v15 = vadd.f32 %v1605_v33, %v2198_v31  ;;  %v1607_v47 = vadd.f32 %v1590_v39, %v1554_v29  ;;  %v1185_v41 = vpop.f32.mrb[3].mxu0 }
 0x117   : > { %v1268_v42 = vadd.f32 %v1606_v37, %v2198_v31  ;;  %v1608_v52 = vadd.f32 %v1185_v41, %v751_v12 }
 0x118   : > { %v1286_v48 = vmax.f32 %v1270_v15, 0.0  ;;  %v1271_v19 = vadd.f32 %v1607_v47, %v2198_v31 }
 0x119   : > { %v1284_v22 = vmax.f32 %v1268_v42, 0.0  ;;  %v1269_v27 = vadd.f32 %v1608_v52, %v2198_v31 }
 0x11a   : > { %1302 = vst.msk [vmem:[%s2206_s27 + $0x10] sm:$0xff] %vm685_vm2, %v1286_v48  ;;  %v1287_v28 = vmax.f32 %v1271_v19, 0.0 }
 0x11b   : > { %1300 = vst.msk [vmem:[%s2206_s27] sm:$0xff] %vm685_vm2, %v1284_v22  ;;  %v1285_v23 = vmax.f32 %v1269_v27, 0.0 }
 0x11c   : > { %1303 = vst.msk [vmem:[%s2206_s27 + $0x18] sm:$0xff] %vm685_vm2, %v1287_v28 }
 0x11d   : > { %1301 = vst.msk [vmem:[%s2206_s27 + $0x8] sm:$0xff] %vm685_vm2, %v1285_v23 }
 0x120   : > { %v1593_v34 = vpop.f32.mrb[4].mxu0 }
 0x121   : > { %v1609_v5 = vadd.f32 %v1593_v34, %v1557_v56  ;;  %v1198_v51 = vpop.f32.mrb[5].mxu0 }
 0x122   : > { %v1610_v24 = vadd.f32 %v1198_v51, %v764_v43  ;;  %v1594_v36 = vpop.f32.mrb[6].mxu0 }
 0x123   : > { %v1274_v1 = vadd.f32 %v1609_v5, %v2198_v31  ;;  %v1611_v45 = vadd.f32 %v1594_v36, %v1558_v30  ;;  %v1201_v46 = vpop.f32.mrb[7].mxu0 }
 0x124   : > { %v1272_v53 = vadd.f32 %v1610_v24, %v2198_v31  ;;  %v1612_v38 = vadd.f32 %v1201_v46, %v767_v25 }
 0x125   : > { %v1290_v6 = vmax.f32 %v1274_v1, 0.0  ;;  %v1275_v32 = vadd.f32 %v1611_v45, %v2198_v31 }
 0x126   : > { %v1288_v7 = vmax.f32 %v1272_v53, 0.0  ;;  %v1273_v8 = vadd.f32 %v1612_v38, %v2198_v31 }
 0x127   : > { %1306 = vst.msk [vmem:[%s2206_s27 + $0x30] sm:$0xff] %vm685_vm2, %v1290_v6  ;;  %v1291_v54 = vmax.f32 %v1275_v32, 0.0 }
 0x128   : > { %1304 = vst.msk [vmem:[%s2206_s27 + $0x20] sm:$0xff] %vm685_vm2, %v1288_v7  ;;  %v1289_v55 = vmax.f32 %v1273_v8, 0.0 }
 0x129   : > { %1307 = vst.msk [vmem:[%s2206_s27 + $0x38] sm:$0xff] %vm685_vm2, %v1291_v54 }
 0x12a   : > { %1305 = vst.msk [vmem:[%s2206_s27 + $0x28] sm:$0xff] %vm685_vm2, %v1289_v55 }
 0x133   : > { %v1597_v57 = vpop.f32.mrb[8].mxu0 }
 0x134   : > { %v1214_v58 = vpop.f32.mrb[9].mxu0 }
 0x135   : > { %v1598_v59 = vpop.f32.mrb[10].mxu0  ;;  %v1579_v60 = vpop.f32.mrb[8].mxu1 }
 0x136   : > { %v1613_v61 = vadd.f32 %v1597_v57, %v1579_v60  ;;  %v1217_v9 = vpop.f32.mrb[11].mxu0  ;;  %v904_v50 = vpop.f32.mrb[9].mxu1 }
 0x137   : > { %v1614_v62 = vadd.f32 %v1214_v58, %v904_v50  ;;  %v1580_v3 = vpop.f32.mrb[10].mxu1 }
 0x138   : > { %v1278_v4 = vadd.f32 %v1613_v61, %v2198_v31  ;;  %v1615_v40 = vadd.f32 %v1598_v59, %v1580_v3  ;;  %v907_v63 = vpop.f32.mrb[11].mxu1 }
 0x139   : > { %v1276_v0 = vadd.f32 %v1614_v62, %v2198_v31  ;;  %v1616_v2 = vadd.f32 %v1217_v9, %v907_v63 }
 0x13a   : > { %v1294_v10 = vmax.f32 %v1278_v4, 0.0  ;;  %v1279_v11 = vadd.f32 %v1615_v40, %v2198_v31 }
 0x13b   : > { %v1292_v13 = vmax.f32 %v1276_v0, 0.0  ;;  %v1277_v16 = vadd.f32 %v1616_v2, %v2198_v31 }
 0x13c   : > { %1310 = vst.msk [vmem:[%s2206_s27 + $0x50] sm:$0xff] %vm685_vm2, %v1294_v10  ;;  %v1295_v17 = vmax.f32 %v1279_v11, 0.0 }
 0x13d   : > { %1308 = vst.msk [vmem:[%s2206_s27 + $0x40] sm:$0xff] %vm685_vm2, %v1292_v13  ;;  %v1293_v18 = vmax.f32 %v1277_v16, 0.0  ;;  %v1583_v49 = vpop.f32.mrb[12].mxu1 }
 0x13e   : > { %1311 = vst.msk [vmem:[%s2206_s27 + $0x58] sm:$0xff] %vm685_vm2, %v1295_v17  ;;  %v920_v44 = vpop.f32.mrb[13].mxu1 }
 0x13f   : > { %1309 = vst.msk [vmem:[%s2206_s27 + $0x48] sm:$0xff] %vm685_vm2, %v1293_v18  ;;  %v1584_v20 = vpop.f32.mrb[14].mxu1 }
 0x140   : > { %v923_v21 = vpop.f32.mrb[15].mxu1 }
 0x142   : > { %v1601_v26 = vpop.f32.mrb[12].mxu0 }
 0x143   : > { %v1230_v29 = vpop.f32.mrb[13].mxu0  ;;  %v1617_v12 = vadd.f32 %v1601_v26, %v1583_v49 }
 0x144   : > { %v1602_v56 = vpop.f32.mrb[14].mxu0  ;;  %v1618_v43 = vadd.f32 %v1230_v29, %v920_v44 }
 0x145   : > { %v1282_v30 = vadd.f32 %v1617_v12, %v2198_v31  ;;  %v1233_v25 = vpop.f32.mrb[15].mxu0  ;;  %v1619_v35 = vadd.f32 %v1602_v56, %v1584_v20 }
 0x146   : > { %v1280_v33 = vadd.f32 %v1618_v43, %v2198_v31  ;;  %v1620_v14 = vadd.f32 %v1233_v25, %v923_v21 }
 0x147   : > { %v1298_v37 = vmax.f32 %v1282_v30, 0.0  ;;  %v1283_v39 = vadd.f32 %v1619_v35, %v2198_v31 }
 0x148   : > { %v1296_v15 = vmax.f32 %v1280_v33, 0.0  ;;  %v1281_v47 = vadd.f32 %v1620_v14, %v2198_v31 }
 0x149   : > { %1314 = vst.msk [vmem:[%s2206_s27 + $0x70] sm:$0xff] %vm685_vm2, %v1298_v37  ;;  %v1299_v41 = vmax.f32 %v1283_v39, 0.0 }
 0x14a   : > { %1312 = vst.msk [vmem:[%s2206_s27 + $0x60] sm:$0xff] %vm685_vm2, %v1296_v15  ;;  %v1297_v42 = vmax.f32 %v1281_v47, 0.0 }
 0x14b   : > { %1315 = vst.msk [vmem:[%s2206_s27 + $0x78] sm:$0xff] %vm685_vm2, %v1299_v41 }
 0x14c   : > { %1313 = vst.msk [vmem:[%s2206_s27 + $0x68] sm:$0xff] %vm685_vm2, %v1297_v42 }
 0x14d PF: > { %s15_s22 = sadd.s32 1, %s1719_s22   ;;  %s2280_s18 = smov %s1711_s20 }
 0x14e   : > { %p12_p13 = scmp.ge.s32.totalorder %s15_s22, 6   ;;  %s2281_s19 = smov %s1715_s21 }
 0x14f   : > { %s2282_s20 = smov %s2285_s23  ;;  %s2283_s21 = smov %s2289_s24 }
 0x150   :  { %14 = sbr.rel (!%p12_p13) target bundleno = 3 (0x3), region = 78 }

</bundles_post_ra>
